<compile_context>
chip_gen: v7x
topology: tpu7x:2x2x1
jax: 0.10.0
libtpu: 0.0.40
codegen_flags: <defaults>
</compile_context>

<pallas_src>
import jax
import jax.numpy as jnp
from jax.experimental import pallas as pl
from jax.experimental.pallas import tpu as pltpu


def _make_event_kernel(doses, denom):
    """Kernel body with the dosing times statically unrolled as closure constants."""
    n = len(doses)

    def event_kernel(t_ref, o_ref):
        t = t_ref[...]
        dt = t.dtype
        if n == 0:
            acc = jnp.ones_like(t)
        else:
            acc = t - jnp.asarray(doses[0], dt)
            for d in doses[1:]:
                acc = acc * (t - jnp.asarray(d, dt))
        # Exact divide (not multiply-by-reciprocal) to match the PyTorch reference.
        o_ref[...] = (acc / jnp.asarray(denom, dt)).astype(o_ref.dtype)

    return event_kernel


def _event_jnp(t, doses, denom):
    """Fused-elementwise fallback for small / ragged inputs."""
    acc = jnp.ones_like(t)
    for d in doses:
        acc = acc * (t - jnp.asarray(d, t.dtype))
    return acc / jnp.asarray(denom, t.dtype)


# Lane widths tried (largest first) when flattening to a lane-dense slab.
_LANE_WIDTHS = (2048, 1024, 512, 256, 128)


def _choose_tr(rows, cols, itemsize, target_block_bytes, min_blocks):
    """Pick a row-block size that is a multiple of 8 (or the full row extent),
    keeps one block <= target_block_bytes, and yields >= min_blocks grid steps
    whenever rows permit (megacore balance on v7x)."""
    cap = max(8, (target_block_bytes // (cols * itemsize)) // 8 * 8)
    if rows < 8 * min_blocks:
        # Too small to split usefully: one block (full-extent block is legal
        # even when rows is not a multiple of 8).
        if rows % 8 == 0 or rows > cap:
            return min(rows, cap)
        return rows
    # Enough rows to split: aim for ~min_blocks blocks, capped by the byte budget.
    balanced = (-(-rows // min_blocks) + 7) // 8 * 8
    return max(8, min(cap, balanced))


def event_func(t, y, dosing_times, *,
               target_block_bytes=4 << 20,   # 4 MiB block -> 16 MiB pipelined footprint
               min_pallas_bytes=8 << 20,     # below this, XLA's fused elementwise wins
               min_blocks=4,                 # >= 2x v7x TensorCores
               force_pallas=False):
    """Pallas implementation of EventFunc.forward(t, y).

    t: float array of any shape.
    y: ignored (interface parity with the PyTorch module).
    dosing_times: static sequence of dose times (module parameter).
    """
    del y  # unused by the forward pass, exactly like the PyTorch module
    doses = tuple(float(d) for d in dosing_times)
    denom = 10.0 ** (len(doses) - 1)

    size = t.size
    itemsize = jnp.dtype(t.dtype).itemsize

    # Small inputs: fixed launch + per-step pipeline overhead dominate; let XLA fuse.
    if not force_pallas and size * itemsize < min_pallas_bytes:
        return _event_jnp(t, doses, denom)

    # Flatten to a lane-dense (rows, cols) slab so stores are unmasked vst.
    cols = next((c for c in _LANE_WIDTHS if size % c == 0), None)
    if cols is None:
        # Ragged total size: masked partial stores would eat the win; fall back.
        return _event_jnp(t, doses, denom)
    rows = size // cols

    tr = _choose_tr(rows, cols, itemsize, target_block_bytes, min_blocks)
    grid = (pl.cdiv(rows, tr),)

    flops_per_elem = 2 * max(len(doses), 1) + 1  # sub+mul per dose, plus the divide
    cost = pl.CostEstimate(
        flops=flops_per_elem * size,
        transcendentals=0,
        bytes_accessed=2 * size * itemsize,
    )

    out2d = pl.pallas_call(
        _make_event_kernel(doses, denom),
        out_shape=jax.ShapeDtypeStruct((rows, cols), t.dtype),
        grid=grid,
        in_specs=[pl.BlockSpec((tr, cols), lambda i: (i, 0))],
        out_specs=pl.BlockSpec((tr, cols), lambda i: (i, 0)),
        compiler_params=pltpu.CompilerParams(
            dimension_semantics=("parallel",),
            vmem_limit_bytes=64 << 20,   # clears v5e's 16 MiB default; <= v7x physical
        ),
        cost_estimate=cost,
    )(t.reshape(rows, cols))

    return out2d.reshape(t.shape)


def event_func_ref(t, y, dosing_times):
    """Pure-JAX reference mirroring the PyTorch forward."""
    del y
    result = jnp.ones_like(t)
    for d in dosing_times:
        result = result * (t - jnp.asarray(d, t.dtype))
    return result / jnp.asarray(10.0 ** (len(dosing_times) - 1), t.dtype)


if __name__ == "__main__":
    key = jax.random.PRNGKey(0)
    k1, k2, k3 = jax.random.split(key, 3)

    # Static "parameters" of the module: the dosing times from __init__.
    dosing_times = [1.0, 3.0, 5.0]

    # Case 1: 2-D input forced through the Pallas path.  The wrapper flattens it
    # to a lane-dense (64, 2048) slab and runs a 4-step "parallel" grid.
    t1 = jax.random.uniform(k1, (64, 2048), dtype=jnp.float32) * 10.0
    y1 = jax.random.normal(k2, (64, 2048), dtype=jnp.float32)  # unused, interface parity
    out1 = jax.block_until_ready(event_func(t1, y1, dosing_times, force_pallas=True))
    ref1 = event_func_ref(t1, y1, dosing_times)
    assert out1.shape == t1.shape and out1.dtype == t1.dtype
    assert jnp.allclose(out1, ref1, rtol=1e-6, atol=1e-6), "Pallas path mismatch vs reference"

    # Case 2: small 4-D input (module accepts any t shape); forced through Pallas
    # to exercise the flatten->lane-dense reshape with a full-extent block.
    t2 = jax.random.uniform(k3, (2, 4, 16, 32), dtype=jnp.float32) * 10.0
    out2 = jax.block_until_ready(event_func(t2, None, dosing_times, force_pallas=True))
    ref2 = event_func_ref(t2, None, dosing_times)
    assert out2.shape == t2.shape
    assert jnp.allclose(out2, ref2, rtol=1e-6, atol=1e-6), "4-D Pallas path mismatch"

    # Case 3: tiny input takes the fused-jnp fallback (bytes-based threshold).
    t3 = jnp.linspace(0.0, 8.0, 37, dtype=jnp.float32)
    out3 = jax.block_until_ready(event_func(t3, None, dosing_times))
    ref3 = event_func_ref(t3, None, dosing_times)
    assert jnp.allclose(out3, ref3, rtol=1e-6, atol=1e-6), "fallback path mismatch"

    print("KERNEL_OK")
</pallas_src>

<mosaic_0001>
module attributes {stable_mosaic.version = 11 : i64} {
  func.func @event_kernel(%arg0: i32, %arg1: memref<16x2048xf32, #tpu.memory_space<vmem>>, %arg2: memref<16x2048xf32, #tpu.memory_space<vmem>>) attributes {dimension_semantics = [#tpu.dimension_semantics<parallel>], iteration_bounds = array<i64: 4>, scalar_prefetch = 0 : i64, scratch_operands = 0 : i64, tpu.core_type = #tpu.core_type<tc>, window_params = [{transform_indices = @transform_0, window_bounds = array<i64: 16, 2048>}, {transform_indices = @transform_1, window_bounds = array<i64: 16, 2048>}]} {
    %c0 = arith.constant 0 : index
    %c0_0 = arith.constant 0 : index
    %0 = vector.load %arg1[%c0, %c0_0] : memref<16x2048xf32, #tpu.memory_space<vmem>>, vector<16x2048xf32>
    %cst = arith.constant 1.000000e+00 : f32
    %1 = vector.broadcast %cst : f32 to vector<16x2048xf32>
    %2 = arith.subf %0, %1 : vector<16x2048xf32>
    %cst_1 = arith.constant 3.000000e+00 : f32
    %3 = vector.broadcast %cst_1 : f32 to vector<16x2048xf32>
    %4 = arith.subf %0, %3 : vector<16x2048xf32>
    %5 = arith.mulf %2, %4 : vector<16x2048xf32>
    %cst_2 = arith.constant 5.000000e+00 : f32
    %6 = vector.broadcast %cst_2 : f32 to vector<16x2048xf32>
    %7 = arith.subf %0, %6 : vector<16x2048xf32>
    %8 = arith.mulf %5, %7 : vector<16x2048xf32>
    %cst_3 = arith.constant 1.000000e+02 : f32
    %9 = vector.broadcast %cst_3 : f32 to vector<16x2048xf32>
    %10 = arith.divf %8, %9 : vector<16x2048xf32>
    %c0_4 = arith.constant 0 : index
    %c0_5 = arith.constant 0 : index
    %11 = vector.load %arg2[%c0_4, %c0_5] : memref<16x2048xf32, #tpu.memory_space<vmem>>, vector<16x2048xf32>
    tpu.vector_store %arg2[%c0_4, %c0_5], %10 {strides = array<i32>} : memref<16x2048xf32, #tpu.memory_space<vmem>>, vector<16x2048xf32>,
    return
  }
  func.func @transform_0(%arg0: i32) -> (i32, i32) {
    %c0_i32 = arith.constant 0 : i32
    %c0_i32_0 = arith.constant 0 : i32
    return %arg0, %c0_i32 : i32, i32
  }
  func.func @transform_1(%arg0: i32) -> (i32, i32) {
    %c0_i32 = arith.constant 0 : i32
    %c0_i32_0 = arith.constant 0 : i32
    return %arg0, %c0_i32 : i32, i32
  }
}

</mosaic_0001>

<bundles_post_ra>
// kernel: tpu_custom_call.1
= control target key start
LH: loop header
LB: loop body
LE: loop exit
PB: predicated region body
PF: predicated region fallthrough
CT: control target
= control target key end

     0   :  { %6 = vsyncpa [#allocation3], 0  ;;  %s996_s0 = inlined_call_operand.hbm [shape: f32[64,2048], index: 0, kind: input, shape index: {}]   ;;  %s997_s1 = inlined_call_operand.hbm [shape: f32[64,2048], index: 1, kind: output, shape index: {}]  }
   0x1   :  { %8 = vsyncpa [#allocation3 + $0x1], 0 }
   0x2   :  { %9 = vsyncpa [#allocation4], 0 }
   0x3   :  { %11 = vsyncpa [#allocation4 + $0x1], 0  ;;  %s763_s6 = smov 0   ;;  %s765_s7 = smov 0  }
   0x4   :  { %s767_s8 = smov 0   ;;  %s769_s9 = smov 0  }
   0x5 LB: > { %s784_s10 = sadd.s32 4294967295, %s745_s9   ;;  %s483_s11 = sadd.s32 4294967294, %s745_s9   ;;  %s745_s9 = sphi %s769_s9, %s1009_s9   ;;  %s741_s8 = sphi %s767_s8, %s1008_s8   ;;  %s737_s7 = sphi %s765_s7, %s1007_s7   ;;  %s733_s6 = sphi %s763_s6, %s1006_s6  }
   0x6   : > { %s788_s12 = sadd.s32 1, %s745_s9   ;;  %s24_s13 = sadd.s32 1, %s741_s8 }
   0x7   : > { %s21_s14 = ssub.s32 %s745_s9, %s788_s12  ;;  %p31_p0 = scmp.ne.s32.totalorder %s741_s8, %s737_s7 }
   0x8   : > { %p22_p1 = scmp.eq.s32.totalorder %s21_s14, 0  ;;  %p32_p2 = scmp.eq.s32.totalorder %s745_s9, 0 }
   0x9   : > { %p37_p3 = scmp.ne.s32.totalorder %s737_s7, %s733_s6  ;;  %p38_p4 = scmp.eq.s32.totalorder %s784_s10, 0 }
   0xa   : > { %s800_s15 = scalar_select %p22_p1, %s741_s8, %s24_s13  }
   0xb   : > { %p802_p5 = por %p32_p2, %p31_p0  ;;  %p806_p6 = por %p38_p4, %p37_p3 }
   0xc   : > { %p61_p7 = scmp.eq.s32.totalorder %s784_s10, 3  ;;  %p67_p8 = scmp.eq.s32.totalorder %s483_s11, 3 }
   0xd   : > { %p611_p9 = scmp.lt.s32.totalorder %s745_s9, 4  ;;  %s87_s20 = sand.u32 1, %s741_s8  }
   0xe   : > { %p812_p10 = por %p61_p7, %p31_p0  ;;  %p816_p11 = por %p67_p8, %p37_p3 }
   0xf   : > { %s596_s21 = sshll.u32 %s745_s9, 12  ;;  %s486_s22 = sshll.u32 %s87_s20, 8 }
  0x10   : > { %s1001_s18 = scalar_select %p812_p10, 1, 0 }
  0x11   : > { %s1002_s19 = scalar_select %p816_p11, 1, 0 }
  0x12   : > { %s825_s25 = scalar_lea.hbm %s996_s0, %s596_s21  ;;  %s91_s26 = scalar_lea.vmem [#allocation2], %s486_s22 }
  0x13   : > { %s99_s27 = sshll.u32 %s91_s26, 4  ;;  %p829_p12 = pnand %p611_p9, %p802_p5  ;;  %s833_s27 = int_to_ptr.vmem [resolvable:$true] %s99_s27 }
  0x14   : > { %s835_s29 = scalar_lea.sflag [#allocation3], %s87_s20  ;;  %s649_s30 = scalar_lea.hbm %s825_s25, 4096 }
  0x15   : > { %p650_p13 = scmp.ne.s32.totalorder %s825_s25, %s649_s30  ;;  %p651_p0 = pneg %p829_p12 }
  0x16   : > { %s654_s4 = scalar_lea.hbm %s996_s0, 16384  ;;  %p655_p3 = scmp.lt.u32.totalorder %s825_s25, %s996_s0 }
  0x17   : > { %p652_p1 = pnand %p651_p0, %p650_p13  ;;  %p656_p4 = scmp.lt.u32.totalorder %s654_s4, %s649_s30 }
  0x18   : > { %p658_p7 = scmp.lt.u32.totalorder %s649_s30, %s825_s25 }
  0x19   : > { %p653_p2 = pneg %p652_p1  ;;  %p657_p5 = por %p656_p4, %p655_p3 }
  0x1b   : > { %p659_p8 = por %p658_p7, %p657_p5 }
  0x1d   : > { %p660_p9 = pnand %p659_p8, %p653_p2 }
  0x1f   : > { %663 = shalt.err (!%p660_p9)
}
  0x20   : > { %s664_s13 = scalar_lea.vmem %s833_s27, 4096  ;;  %s747_s14 = smov [#allocation2]  }
  0x21   : > { %p665_p13 = scmp.ne.s32.totalorder %s833_s27, %s664_s13  ;;  %s669_s16 = sshll.u32 %s747_s14, 4  ;;  %s670_s16 = int_to_ptr.vmem [resolvable:$false] %s669_s16 }
  0x22   : > { %s671_s20 = scalar_lea.vmem %s670_s16, 8192  ;;  %p672_p10 = scmp.lt.s32.totalorder %s833_s27, %s670_s16 }
  0x23   : > { %p667_p1 = pnand %p665_p13, %p651_p0  ;;  %p673_p3 = scmp.lt.s32.totalorder %s671_s20, %s664_s13 }
  0x25   : > { %p668_p11 = pneg %p667_p1  ;;  %p674_p4 = por %p673_p3, %p672_p10 }
  0x27   : > { %p675_p5 = pnand %p674_p4, %p668_p11 }
  0x29   : > { %678 = shalt.err (!%p675_p5)
}
  0x2a   : > { %s748_s21 = smov 2048   ;;  %s749_s22 = smov 128  }
  0x2b   : > { %606 = dma.hbm_to_vmem [thread:$0]  (!%p829_p12), %s825_s25, 4096, %s833_s27, %s835_s29, %s748_s21, %s748_s21, %s749_s22  }
  0x2c   : > { %p490_p0 = scmp.ge.s32.totalorder %s745_s9, 1  ;;  %p107_p2 = scmp.lt.s32.totalorder %s745_s9, 5 }
  0x2e   : > { %p108_p7 = pnand %p490_p0, %p107_p2 }
  0x2f   : > { %s866_s23 = sand.u32 (!%p108_p7), 1, %s737_s7  }
  0x30   : > { %111 = sbr.rel (%p108_p7) target bundleno = 125 (0x7d), region = 24  ;;  %s491_s24 = sshll.u32 (!%p108_p7), %s866_s23, 8 }
  0x31   : > { %s114_s26 = scalar_lea.sflag (!%p108_p7), [#allocation3], %s866_s23  ;;  %s872_s30 = scalar_lea.vmem (!%p108_p7), [#allocation2], %s491_s24 }
  0x37   : > { %724 = dma.done.wait (%p806_p6), %s114_s26, 4096  }
  0x38   : > { %726 = vsyncadd (%p806_p6), %s114_s26, 4294963200  ;;  %v138_v0 = vld [vmem:[%s872_s30] sm:$0xff]  ;;  %v139_v1 = vld [vmem:[%s872_s30 + $0x8] sm:$0xff]  ;;  %s889_s17 = scalar_lea.vmem [#allocation5], %s491_s24  ;;  %s598_s25 = sshll.u32 %s784_s10, 12 }
  0x39   : > { %v140_v2 = vld [vmem:[%s872_s30 + $0x10] sm:$0xff]  ;;  %v493_v3 = vadd.f32 -1.0, %v138_v0  ;;  %v525_v4 = vadd.f32 -3.0, %v138_v0  ;;  %v557_v5 = vadd.f32 -5.0, %v138_v0  ;;  %v494_v6 = vadd.f32 -1.0, %v139_v1  ;;  %v141_v7 = vld [vmem:[%s872_s30 + $0x18] sm:$0xff]  ;;  %s949_s2 = scalar_lea.hbm %s997_s1, %s598_s25 }
  0x3a   : > { %v142_v8 = vld [vmem:[%s872_s30 + $0x20] sm:$0xff]  ;;  %v526_v9 = vadd.f32 -3.0, %v139_v1  ;;  %v558_v10 = vadd.f32 -5.0, %v139_v1  ;;  %v495_v11 = vadd.f32 -1.0, %v140_v2  ;;  %v527_v12 = vadd.f32 -3.0, %v140_v2  ;;  %v143_v17 = vld [vmem:[%s872_s30 + $0x28] sm:$0xff] }
  0x3b   : > { %v234_v13 = vmul.f32 %v525_v4, %v493_v3  ;;  %v559_v14 = vadd.f32 -5.0, %v140_v2  ;;  %v496_v15 = vadd.f32 -1.0, %v141_v7  ;;  %v528_v16 = vadd.f32 -3.0, %v141_v7  ;;  %v144_v26 = vld [vmem:[%s872_s30 + $0x30] sm:$0xff]  ;;  %v145_v35 = vld [vmem:[%s872_s30 + $0x38] sm:$0xff]  ;;  %v146_v40 = vld [vmem:[%s872_s30 + $0x40] sm:$0xff] }
  0x3c   : > { %v235_v18 = vmul.f32 %v526_v9, %v494_v6  ;;  %v236_v19 = vmul.f32 %v527_v12, %v495_v11  ;;  %v560_v20 = vadd.f32 -5.0, %v141_v7  ;;  %v497_v21 = vadd.f32 -1.0, %v142_v8  ;;  %v147_v45 = vld [vmem:[%s872_s30 + $0x48] sm:$0xff]  ;;  %v148_v54 = vld [vmem:[%s872_s30 + $0x50] sm:$0xff]  ;;  %v149_v59 = vld [vmem:[%s872_s30 + $0x58] sm:$0xff]  ;;  %s410_s27 = sshll.u32 %s889_s17, 4  ;;  %s951_s27 = int_to_ptr.vmem [resolvable:$true] %s410_s27 }
  0x3d   : > { %v298_v22 = vmul.f32 %v557_v5, %v234_v13  ;;  %v237_v23 = vmul.f32 %v528_v16, %v496_v15  ;;  %v529_v24 = vadd.f32 -3.0, %v142_v8  ;;  %v561_v25 = vadd.f32 -5.0, %v142_v8  ;;  %v150_v4 = vld [vmem:[%s872_s30 + $0x60] sm:$0xff]  ;;  %v151_v9 = vld [vmem:[%s872_s30 + $0x68] sm:$0xff]  ;;  %s396_s10 = scalar_lea.sflag [#allocation4], %s866_s23  ;;  %s679_s3 = scalar_lea.vmem %s951_s27, 4096 }
  0x3e   : > { %v299_v27 = vmul.f32 %v558_v10, %v235_v18  ;;  %v300_v28 = vmul.f32 %v559_v14, %v236_v19  ;;  %v498_v29 = vadd.f32 -1.0, %v143_v17  ;;  %v530_v30 = vadd.f32 -3.0, %v143_v17  ;;  %v152_v18 = vld [vmem:[%s872_s30 + $0x70] sm:$0xff]  ;;  %p680_p6 = scmp.ne.s32.totalorder %s951_s27, %s679_s3  ;;  %p1004_p10 = scmp.ne.s32.totalorder %s1001_s18, 0 }
  0x3f   : > { %v331_v31 = vmul.f32 0.01, %v298_v22  ;;  %v301_v32 = vmul.f32 %v560_v20, %v237_v23  ;;  %v238_v33 = vmul.f32 %v529_v24, %v497_v21  ;;  %v562_v34 = vadd.f32 -5.0, %v143_v17  ;;  %v153_v23 = vld [vmem:[%s872_s30 + $0x78] sm:$0xff]  ;;  %s750_s4 = smov [#allocation5]  }
  0x40   : > { %v332_v36 = vmul.f32 0.01, %v299_v27  ;;  %v333_v37 = vmul.f32 0.01, %v300_v28  ;;  %v239_v38 = vmul.f32 %v530_v30, %v498_v29  ;;  %v499_v39 = vadd.f32 -1.0, %v144_v26  ;;  %p681_p11 = pnand %p680_p6, %p1004_p10  ;;  %s683_s5 = sshll.u32 %s750_s4, 4  ;;  %s684_s5 = int_to_ptr.vmem [resolvable:$false] %s683_s5 }
  0x41   : > { %363 = vst [vmem:[%s889_s17] sm:$0xff] %v331_v31  ;;  %v334_v41 = vmul.f32 0.01, %v301_v32  ;;  %v302_v42 = vmul.f32 %v561_v25, %v238_v33  ;;  %v531_v43 = vadd.f32 -3.0, %v144_v26  ;;  %v563_v44 = vadd.f32 -5.0, %v144_v26  ;;  %v154_v32 = vld [vmem:[%s872_s30 + $0x80] sm:$0xff]  ;;  %s685_s11 = scalar_lea.vmem %s684_s5, 8192  ;;  %p686_p8 = scmp.lt.s32.totalorder %s951_s27, %s684_s5 }
  0x42   : > { %364 = vst [vmem:[%s889_s17 + $0x8] sm:$0xff] %v332_v36  ;;  %365 = vst [vmem:[%s889_s17 + $0x10] sm:$0xff] %v333_v37  ;;  %v303_v46 = vmul.f32 %v562_v34, %v239_v38  ;;  %v500_v47 = vadd.f32 -1.0, %v145_v35  ;;  %v532_v48 = vadd.f32 -3.0, %v145_v35  ;;  %v564_v49 = vadd.f32 -5.0, %v145_v35  ;;  %v155_v37 = vld [vmem:[%s872_s30 + $0x88] sm:$0xff]  ;;  %p682_p12 = pneg %p681_p11  ;;  %p687_p9 = scmp.lt.s32.totalorder %s685_s11, %s679_s3 }
  0x43   : > { %366 = vst [vmem:[%s889_s17 + $0x18] sm:$0xff] %v334_v41  ;;  %v335_v50 = vmul.f32 0.01, %v302_v42  ;;  %v240_v51 = vmul.f32 %v531_v43, %v499_v39  ;;  %v501_v52 = vadd.f32 -1.0, %v146_v40  ;;  %v533_v53 = vadd.f32 -3.0, %v146_v40 }
  0x44   : > { %v336_v55 = vmul.f32 0.01, %v303_v46  ;;  %v241_v56 = vmul.f32 %v532_v48, %v500_v47  ;;  %v565_v57 = vadd.f32 -5.0, %v146_v40  ;;  %v502_v58 = vadd.f32 -1.0, %v147_v45  ;;  %v156_v46 = vld [vmem:[%s872_s30 + $0x90] sm:$0xff]  ;;  %p688_p13 = por %p687_p9, %p686_p8 }
  0x45   : > { %367 = vst [vmem:[%s889_s17 + $0x20] sm:$0xff] %v335_v50  ;;  %v304_v60 = vmul.f32 %v563_v44, %v240_v51  ;;  %v242_v61 = vmul.f32 %v533_v53, %v501_v52  ;;  %v534_v62 = vadd.f32 -3.0, %v147_v45  ;;  %v566_v63 = vadd.f32 -5.0, %v147_v45  ;;  %v157_v51 = vld [vmem:[%s872_s30 + $0x98] sm:$0xff] }
  0x46   : > { %368 = vst [vmem:[%s889_s17 + $0x28] sm:$0xff] %v336_v55  ;;  %v305_v0 = vmul.f32 %v564_v49, %v241_v56  ;;  %v503_v1 = vadd.f32 -1.0, %v148_v54  ;;  %v535_v2 = vadd.f32 -3.0, %v148_v54  ;;  %v567_v3 = vadd.f32 -5.0, %v148_v54  ;;  %p689_p1 = pnand %p688_p13, %p682_p12 }
  0x47   : > { %v337_v5 = vmul.f32 0.01, %v304_v60  ;;  %v306_v6 = vmul.f32 %v565_v57, %v242_v61  ;;  %v243_v7 = vmul.f32 %v534_v62, %v502_v58  ;;  %v504_v8 = vadd.f32 -1.0, %v149_v59  ;;  %v158_v60 = vld [vmem:[%s872_s30 + $0xa0] sm:$0xff] }
  0x48   : > { %v338_v10 = vmul.f32 0.01, %v305_v0  ;;  %v244_v11 = vmul.f32 %v535_v2, %v503_v1  ;;  %v536_v12 = vadd.f32 -3.0, %v149_v59  ;;  %v568_v13 = vadd.f32 -5.0, %v149_v59  ;;  %v159_v1 = vld [vmem:[%s872_s30 + $0xa8] sm:$0xff] }
  0x49   : > { %369 = vst [vmem:[%s889_s17 + $0x30] sm:$0xff] %v337_v5  ;;  %v339_v14 = vmul.f32 0.01, %v306_v6  ;;  %v307_v15 = vmul.f32 %v566_v63, %v243_v7  ;;  %v505_v16 = vadd.f32 -1.0, %v150_v4  ;;  %v537_v17 = vadd.f32 -3.0, %v150_v4 }
  0x4a   : > { %370 = vst [vmem:[%s889_s17 + $0x38] sm:$0xff] %v338_v10  ;;  %v308_v19 = vmul.f32 %v567_v3, %v244_v11  ;;  %v245_v20 = vmul.f32 %v536_v12, %v504_v8  ;;  %v569_v21 = vadd.f32 -5.0, %v150_v4  ;;  %v506_v22 = vadd.f32 -1.0, %v151_v9  ;;  %v160_v10 = vld [vmem:[%s872_s30 + $0xb0] sm:$0xff] }
  0x4b   : > { %371 = vst [vmem:[%s889_s17 + $0x40] sm:$0xff] %v339_v14  ;;  %v340_v24 = vmul.f32 0.01, %v307_v15  ;;  %v246_v25 = vmul.f32 %v537_v17, %v505_v16  ;;  %v538_v26 = vadd.f32 -3.0, %v151_v9  ;;  %v570_v27 = vadd.f32 -5.0, %v151_v9  ;;  %v161_v15 = vld [vmem:[%s872_s30 + $0xb8] sm:$0xff] }
  0x4c   : > { %v341_v28 = vmul.f32 0.01, %v308_v19  ;;  %v309_v29 = vmul.f32 %v568_v13, %v245_v20  ;;  %v507_v30 = vadd.f32 -1.0, %v152_v18  ;;  %v539_v31 = vadd.f32 -3.0, %v152_v18 }
  0x4d   : > { %372 = vst [vmem:[%s889_s17 + $0x48] sm:$0xff] %v340_v24  ;;  %v310_v33 = vmul.f32 %v569_v21, %v246_v25  ;;  %v247_v34 = vmul.f32 %v538_v26, %v506_v22  ;;  %v571_v35 = vadd.f32 -5.0, %v152_v18  ;;  %v508_v36 = vadd.f32 -1.0, %v153_v23  ;;  %v162_v24 = vld [vmem:[%s872_s30 + $0xc0] sm:$0xff] }
  0x4e   : > { %373 = vst [vmem:[%s889_s17 + $0x50] sm:$0xff] %v341_v28  ;;  %v342_v38 = vmul.f32 0.01, %v309_v29  ;;  %v248_v39 = vmul.f32 %v539_v31, %v507_v30  ;;  %v540_v40 = vadd.f32 -3.0, %v153_v23  ;;  %v572_v41 = vadd.f32 -5.0, %v153_v23  ;;  %v163_v29 = vld [vmem:[%s872_s30 + $0xc8] sm:$0xff] }
  0x4f   : > { %v343_v42 = vmul.f32 0.01, %v310_v33  ;;  %v311_v43 = vmul.f32 %v570_v27, %v247_v34  ;;  %v509_v44 = vadd.f32 -1.0, %v154_v32  ;;  %v541_v45 = vadd.f32 -3.0, %v154_v32 }
  0x50   : > { %374 = vst [vmem:[%s889_s17 + $0x58] sm:$0xff] %v342_v38  ;;  %v312_v47 = vmul.f32 %v571_v35, %v248_v39  ;;  %v249_v48 = vmul.f32 %v540_v40, %v508_v36  ;;  %v573_v49 = vadd.f32 -5.0, %v154_v32  ;;  %v510_v50 = vadd.f32 -1.0, %v155_v37  ;;  %v164_v38 = vld [vmem:[%s872_s30 + $0xd0] sm:$0xff] }
  0x51   : > { %375 = vst [vmem:[%s889_s17 + $0x60] sm:$0xff] %v343_v42  ;;  %v344_v52 = vmul.f32 0.01, %v311_v43  ;;  %v250_v53 = vmul.f32 %v541_v45, %v509_v44  ;;  %v542_v54 = vadd.f32 -3.0, %v155_v37  ;;  %v574_v55 = vadd.f32 -5.0, %v155_v37  ;;  %v165_v43 = vld [vmem:[%s872_s30 + $0xd8] sm:$0xff] }
  0x52   : > { %v345_v56 = vmul.f32 0.01, %v312_v47  ;;  %v313_v57 = vmul.f32 %v572_v41, %v249_v48  ;;  %v511_v58 = vadd.f32 -1.0, %v156_v46  ;;  %v543_v59 = vadd.f32 -3.0, %v156_v46 }
  0x53   : > { %376 = vst [vmem:[%s889_s17 + $0x68] sm:$0xff] %v344_v52  ;;  %v314_v61 = vmul.f32 %v573_v49, %v250_v53  ;;  %v251_v62 = vmul.f32 %v542_v54, %v510_v50  ;;  %v575_v63 = vadd.f32 -5.0, %v156_v46  ;;  %v512_v0 = vadd.f32 -1.0, %v157_v51  ;;  %v166_v52 = vld [vmem:[%s872_s30 + $0xe0] sm:$0xff] }
  0x54   : > { %377 = vst [vmem:[%s889_s17 + $0x70] sm:$0xff] %v345_v56  ;;  %v346_v2 = vmul.f32 0.01, %v313_v57  ;;  %v252_v3 = vmul.f32 %v543_v59, %v511_v58  ;;  %v544_v4 = vadd.f32 -3.0, %v157_v51  ;;  %v576_v5 = vadd.f32 -5.0, %v157_v51  ;;  %v167_v57 = vld [vmem:[%s872_s30 + $0xe8] sm:$0xff] }
  0x55   : > { %v347_v6 = vmul.f32 0.01, %v314_v61  ;;  %v315_v7 = vmul.f32 %v574_v55, %v251_v62  ;;  %v513_v8 = vadd.f32 -1.0, %v158_v60  ;;  %v545_v9 = vadd.f32 -3.0, %v158_v60 }
  0x56   : > { %378 = vst [vmem:[%s889_s17 + $0x78] sm:$0xff] %v346_v2  ;;  %v316_v11 = vmul.f32 %v575_v63, %v252_v3  ;;  %v253_v12 = vmul.f32 %v544_v4, %v512_v0  ;;  %v577_v13 = vadd.f32 -5.0, %v158_v60  ;;  %v514_v14 = vadd.f32 -1.0, %v159_v1  ;;  %v168_v2 = vld [vmem:[%s872_s30 + $0xf0] sm:$0xff] }
  0x57   : > { %379 = vst [vmem:[%s889_s17 + $0x80] sm:$0xff] %v347_v6  ;;  %v348_v16 = vmul.f32 0.01, %v315_v7  ;;  %v254_v17 = vmul.f32 %v545_v9, %v513_v8  ;;  %v546_v18 = vadd.f32 -3.0, %v159_v1  ;;  %v578_v19 = vadd.f32 -5.0, %v159_v1  ;;  %v169_v7 = vld [vmem:[%s872_s30 + $0xf8] sm:$0xff] }
  0x58   : > { %v349_v20 = vmul.f32 0.01, %v316_v11  ;;  %v317_v21 = vmul.f32 %v576_v5, %v253_v12  ;;  %v515_v22 = vadd.f32 -1.0, %v160_v10  ;;  %v547_v23 = vadd.f32 -3.0, %v160_v10 }
  0x59   : > { %380 = vst [vmem:[%s889_s17 + $0x88] sm:$0xff] %v348_v16  ;;  %v318_v25 = vmul.f32 %v577_v13, %v254_v17  ;;  %v255_v26 = vmul.f32 %v546_v18, %v514_v14  ;;  %v579_v27 = vadd.f32 -5.0, %v160_v10  ;;  %v516_v28 = vadd.f32 -1.0, %v161_v15 }
  0x5a   : > { %381 = vst [vmem:[%s889_s17 + $0x90] sm:$0xff] %v349_v20  ;;  %v350_v30 = vmul.f32 0.01, %v317_v21  ;;  %v256_v31 = vmul.f32 %v547_v23, %v515_v22  ;;  %v548_v32 = vadd.f32 -3.0, %v161_v15  ;;  %v580_v33 = vadd.f32 -5.0, %v161_v15 }
  0x5b   : > { %v351_v34 = vmul.f32 0.01, %v318_v25  ;;  %v319_v35 = vmul.f32 %v578_v19, %v255_v26  ;;  %v517_v36 = vadd.f32 -1.0, %v162_v24  ;;  %v549_v37 = vadd.f32 -3.0, %v162_v24 }
  0x5c   : > { %382 = vst [vmem:[%s889_s17 + $0x98] sm:$0xff] %v350_v30  ;;  %v320_v39 = vmul.f32 %v579_v27, %v256_v31  ;;  %v257_v40 = vmul.f32 %v548_v32, %v516_v28  ;;  %v581_v41 = vadd.f32 -5.0, %v162_v24  ;;  %v518_v42 = vadd.f32 -1.0, %v163_v29 }
  0x5d   : > { %383 = vst [vmem:[%s889_s17 + $0xa0] sm:$0xff] %v351_v34  ;;  %v352_v44 = vmul.f32 0.01, %v319_v35  ;;  %v258_v45 = vmul.f32 %v549_v37, %v517_v36  ;;  %v550_v46 = vadd.f32 -3.0, %v163_v29  ;;  %v582_v47 = vadd.f32 -5.0, %v163_v29 }
  0x5e   : > { %v353_v48 = vmul.f32 0.01, %v320_v39  ;;  %v321_v49 = vmul.f32 %v580_v33, %v257_v40  ;;  %v519_v50 = vadd.f32 -1.0, %v164_v38  ;;  %v551_v51 = vadd.f32 -3.0, %v164_v38 }
  0x5f   : > { %384 = vst [vmem:[%s889_s17 + $0xa8] sm:$0xff] %v352_v44  ;;  %v322_v53 = vmul.f32 %v581_v41, %v258_v45  ;;  %v259_v54 = vmul.f32 %v550_v46, %v518_v42  ;;  %v583_v55 = vadd.f32 -5.0, %v164_v38  ;;  %v520_v56 = vadd.f32 -1.0, %v165_v43 }
  0x60   : > { %385 = vst [vmem:[%s889_s17 + $0xb0] sm:$0xff] %v353_v48  ;;  %v354_v58 = vmul.f32 0.01, %v321_v49  ;;  %v260_v59 = vmul.f32 %v551_v51, %v519_v50  ;;  %v552_v60 = vadd.f32 -3.0, %v165_v43  ;;  %v584_v61 = vadd.f32 -5.0, %v165_v43 }
  0x61   : > { %v355_v62 = vmul.f32 0.01, %v322_v53  ;;  %v323_v63 = vmul.f32 %v582_v47, %v259_v54  ;;  %v521_v0 = vadd.f32 -1.0, %v166_v52  ;;  %v553_v1 = vadd.f32 -3.0, %v166_v52 }
  0x62   : > { %386 = vst [vmem:[%s889_s17 + $0xb8] sm:$0xff] %v354_v58  ;;  %v324_v3 = vmul.f32 %v583_v55, %v260_v59  ;;  %v261_v4 = vmul.f32 %v552_v60, %v520_v56  ;;  %v585_v5 = vadd.f32 -5.0, %v166_v52  ;;  %v522_v6 = vadd.f32 -1.0, %v167_v57 }
  0x63   : > { %387 = vst [vmem:[%s889_s17 + $0xc0] sm:$0xff] %v355_v62  ;;  %v356_v8 = vmul.f32 0.01, %v323_v63  ;;  %v262_v9 = vmul.f32 %v553_v1, %v521_v0  ;;  %v554_v10 = vadd.f32 -3.0, %v167_v57  ;;  %v586_v11 = vadd.f32 -5.0, %v167_v57 }
  0x64   : > { %v357_v12 = vmul.f32 0.01, %v324_v3  ;;  %v325_v13 = vmul.f32 %v584_v61, %v261_v4  ;;  %v523_v14 = vadd.f32 -1.0, %v168_v2  ;;  %v555_v15 = vadd.f32 -3.0, %v168_v2 }
  0x65   : > { %388 = vst [vmem:[%s889_s17 + $0xc8] sm:$0xff] %v356_v8  ;;  %v326_v16 = vmul.f32 %v585_v5, %v262_v9  ;;  %v263_v17 = vmul.f32 %v554_v10, %v522_v6  ;;  %v587_v18 = vadd.f32 -5.0, %v168_v2  ;;  %v524_v19 = vadd.f32 -1.0, %v169_v7 }
  0x66   : > { %389 = vst [vmem:[%s889_s17 + $0xd0] sm:$0xff] %v357_v12  ;;  %v358_v20 = vmul.f32 0.01, %v325_v13  ;;  %v264_v21 = vmul.f32 %v555_v15, %v523_v14  ;;  %v556_v22 = vadd.f32 -3.0, %v169_v7  ;;  %v588_v23 = vadd.f32 -5.0, %v169_v7 }
  0x67   : > { %v359_v24 = vmul.f32 0.01, %v326_v16  ;;  %v327_v25 = vmul.f32 %v586_v11, %v263_v17 }
  0x68   : > { %390 = vst [vmem:[%s889_s17 + $0xd8] sm:$0xff] %v358_v20  ;;  %v328_v26 = vmul.f32 %v587_v18, %v264_v21  ;;  %v265_v27 = vmul.f32 %v556_v22, %v524_v19 }
  0x69   : > { %391 = vst [vmem:[%s889_s17 + $0xe0] sm:$0xff] %v359_v24  ;;  %v360_v28 = vmul.f32 0.01, %v327_v25 }
  0x6a   : > { %v361_v29 = vmul.f32 0.01, %v328_v26  ;;  %v329_v30 = vmul.f32 %v588_v23, %v265_v27 }
  0x6b   : > { %392 = vst [vmem:[%s889_s17 + $0xe8] sm:$0xff] %v360_v28 }
  0x6c   : > { %393 = vst [vmem:[%s889_s17 + $0xf0] sm:$0xff] %v361_v29  ;;  %v362_v31 = vmul.f32 0.01, %v329_v30 }
  0x6e   : > { %394 = vst [vmem:[%s889_s17 + $0xf8] sm:$0xff] %v362_v31 }
  0x6f   : > { %692 = shalt.err (!%p689_p1)
}
  0x70   : > { %s693_s13 = scalar_lea.hbm %s949_s2, 4096  ;;  %s697_s20 = scalar_lea.hbm %s997_s1, 16384 }
  0x71   : > { %p694_p3 = scmp.ne.s32.totalorder %s949_s2, %s693_s13  ;;  %p698_p0 = scmp.lt.u32.totalorder %s949_s2, %s997_s1 }
  0x72   : > { %p699_p2 = scmp.lt.u32.totalorder %s697_s20, %s693_s13  ;;  %p701_p6 = scmp.lt.u32.totalorder %s693_s13, %s949_s2 }
  0x73   : > { %p695_p4 = pnand %p694_p3, %p1004_p10 }
  0x74   : > { %p700_p7 = por %p699_p2, %p698_p0 }
  0x75   : > { %p696_p5 = pneg %p695_p4 }
  0x76   : > { %p702_p11 = por %p701_p6, %p700_p7 }
  0x78   : > { %p703_p12 = pnand %p702_p11, %p696_p5 }
  0x7a   : > { %706 = shalt.err (!%p703_p12)
}
  0x7b   : > { %s751_s24 = smov 2048   ;;  %s752_s26 = smov 128  }
  0x7c   : > { %601 = dma.vmem_to_hbm [thread:$0]  (%p1004_p10), %s951_s27, 4096, %s949_s2, %s396_s10, %s751_s24, %s751_s24, %s752_s26  }
  0x7d PF: > { %p612_p8 = scmp.ge.s32.totalorder %s745_s9, 2  ;;  %s425_s30 = sand.u32 1, %s733_s6  }
  0x7e   : > { %p1005_p9 = scmp.ne.s32.totalorder %s1002_s19, 0  ;;  %s426_s17 = scalar_lea.sflag [#allocation4], %s425_s30 }
  0x80   : > { %p608_p13 = pnand %p612_p8, %p1005_p9 }
  0x82   : > { %728 = dma.done.wait (!%p608_p13), %s426_s17, 4096  }
  0x83   : > { %730 = vsyncadd (!%p608_p13), %s426_s17, 4294963200  ;;  %p14_p1 = scmp.ge.s32.totalorder %s788_s12, 6   ;;  %s1006_s6 = smov %s737_s7 }
  0x84   : > { %s1007_s7 = smov %s741_s8  ;;  %s1008_s8 = smov %s800_s15 }
  0x85   : > { %s1009_s9 = smov %s788_s12  ;;  %16 = sbr.rel (!%p14_p1) target bundleno = 5 (0x5), region = 69 }
  0x8c   :  { %431 = vsyncpa [#allocation3], 1 }
  0x8d   :  { %433 = vsyncpa [#allocation3 + $0x1], 1 }
  0x8e   :  { %434 = vsyncpa [#allocation4], 1 }
  0x8f   :  { %436 = vsyncpa [#allocation4 + $0x1], 1 }

</bundles_post_ra>
